<compile_context>
chip_gen: v6e
topology: v6e:2x2x1
jax: 0.10.0
libtpu: 0.0.40
codegen_flags: <defaults>
</compile_context>

<pallas_src>
import jax
import jax.numpy as jnp
from jax.experimental import pallas as pl
from jax.experimental.pallas import tpu as pltpu


def _round_up(a: int, b: int) -> int:
    return ((a + b - 1) // b) * b


def _cdiv(a: int, b: int) -> int:
    return (a + b - 1) // b


def _patch_embed_kernel(x_ref, w_ref, b_ref, o_ref, acc_ref):
    """One (batch b, N-tile n, channel c) grid step.

    x_ref:   (TNn, P)  patch rows of channel c            (compute dtype)
    w_ref:   (P, Ep)   channel-c slice of the conv weight (compute dtype)
    b_ref:   (1, Ep)   bias (f32)
    o_ref:   (TNn, Ep) output tile                        (output dtype)
    acc_ref: (TNn, Ep) f32 accumulator, resident across the C axis
    """
    c = pl.program_id(2)

    @pl.when(c == 0)
    def _():
        acc_ref[...] = jnp.zeros_like(acc_ref)

    acc_ref[...] += jnp.dot(x_ref[...], w_ref[...],
                            preferred_element_type=jnp.float32)

    @pl.when(c == pl.num_programs(2) - 1)
    def _():
        o_ref[...] = (acc_ref[...] + b_ref[...]).astype(o_ref.dtype)


def patch_embedding(x, weight, bias, patch_size: int, *,
                    compute_dtype=jnp.bfloat16):
    """Conv1d(C->E, kernel=stride=patch_size) followed by permute(0, 2, 1).

    x: (B, C, L); weight: (E, C, P); bias: (E,).  Returns (B, N, E) in x.dtype.
    """
    B, C, L = x.shape
    E, Cw, P = weight.shape
    assert Cw == C and P == patch_size
    assert L % patch_size == 0, (
        f"Input image size must be divisble by patch size, "
        f"image shape: {L}, patch size: {patch_size}"
    )
    N = L // patch_size
    out_dtype = x.dtype
    cbytes = jnp.dtype(compute_dtype).itemsize
    obytes = jnp.dtype(out_dtype).itemsize

    # Lane-pad E to a multiple of 128 only when the inflation is < 2x;
    # small E keeps full-extent (masked) stores instead of 6x output traffic.
    Ep = _round_up(E, 128)
    Ep = Ep if Ep <= 2 * E else E

    # --- Operand layouts (free or tiny; no HBM pass over the activations) ---
    x4 = x.reshape(B, C, N, P).astype(compute_dtype)              # (B, C, N, P)
    w3 = weight.transpose(1, 2, 0)                                # (C, P, E) tiny
    w3 = jnp.pad(w3, ((0, 0), (0, 0), (0, Ep - E))).astype(compute_dtype)
    b2 = jnp.pad(bias.astype(jnp.float32).reshape(1, E), ((0, 0), (0, Ep - E)))

    # --- Tile the per-batch row axis N; E stays a single resident block -----
    def vmem_bytes(tn):
        x_b = tn * P * cbytes
        w_b = P * Ep * cbytes
        b_b = Ep * 4
        o_b = tn * Ep * obytes
        acc = tn * Ep * 4
        return 2 * (x_b + w_b + b_b + o_b) + acc                  # double-buffered

    budget = 20 * 1024 * 1024
    TNn = N if N <= 1024 else 1024
    while TNn > 8 and vmem_bytes(TNn) > budget:
        TNn = max(8, (TNn // 2) // 8 * 8)
    grid_n = _cdiv(N, TNn)
    # Keep >= 2 parallel grid steps so both v7x TensorCores get work.
    if B * grid_n < 2 and N >= 16:
        TNn = _round_up(_cdiv(N, 2), 8)
        grid_n = _cdiv(N, TNn)

    cost = pl.CostEstimate(
        flops=2 * B * N * C * P * E,
        transcendentals=0,
        bytes_accessed=(B * C * N * P * cbytes          # activations, read once
                        + C * P * Ep * cbytes           # weight (resident)
                        + Ep * 4                        # bias
                        + B * N * Ep * obytes),         # output
    )

    out_p = pl.pallas_call(
        _patch_embed_kernel,
        out_shape=jax.ShapeDtypeStruct((B, N, Ep), out_dtype),
        grid=(B, grid_n, C),
        in_specs=[
            pl.BlockSpec((None, None, TNn, P), lambda b, n, c: (b, c, n, 0)),
            pl.BlockSpec((None, P, Ep), lambda b, n, c: (c, 0, 0)),
            pl.BlockSpec((1, Ep), lambda b, n, c: (0, 0)),
        ],
        out_specs=pl.BlockSpec((None, TNn, Ep), lambda b, n, c: (b, n, 0)),
        scratch_shapes=[pltpu.VMEM((TNn, Ep), jnp.float32)],
        compiler_params=pltpu.CompilerParams(
            dimension_semantics=("parallel", "parallel", "arbitrary"),
            vmem_limit_bytes=40 * 1024 * 1024,
        ),
        cost_estimate=cost,
    )(x4, w3, b2)

    return out_p if Ep == E else out_p[:, :, :E]


if __name__ == "__main__":
    key = jax.random.PRNGKey(0)

    def make_params(k, C, P, E):
        kw, kb = jax.random.split(k)
        fan_in = C * P
        bound = 1.0 / (fan_in ** 0.5)
        w = jax.random.uniform(kw, (E, C, P), jnp.float32, -bound, bound)
        b = jax.random.uniform(kb, (E,), jnp.float32, -bound, bound)
        return w, b

    def reference(x, w, b, P):
        B, C, L = x.shape
        E = w.shape[0]
        N = L // P
        patches = x.reshape(B, C, N, P).transpose(0, 2, 1, 3).reshape(B, N, C * P)
        return jnp.einsum("bnk,ek->bne", patches, w.reshape(E, C * P)) + b

    # --- Case 1: module defaults (in_channels=1, patch_size=20, emb=20). ----
    B, C, P, E, N = 2, 1, 20, 20, 8
    L = N * P
    k1, k2, key = jax.random.split(key, 3)
    x = jax.random.normal(k1, (B, C, L), jnp.float32)
    w, b = make_params(k2, C, P, E)
    ref = reference(x, w, b, P)

    out_bf16 = patch_embedding(x, w, b, P)                            # bf16 stream
    out_f32 = patch_embedding(x, w, b, P, compute_dtype=jnp.float32)  # exact path
    jax.block_until_ready((out_bf16, out_f32))
    assert out_bf16.shape == (B, N, E) and out_f32.shape == (B, N, E)
    assert jnp.allclose(out_f32, ref, atol=1e-5, rtol=1e-5)
    assert jnp.allclose(out_bf16, ref, atol=5e-2, rtol=5e-2)

    # --- Case 2: multi-channel (fused in-kernel channel reduction), E padded.
    B, C, P, E, N = 2, 4, 16, 96, 32
    L = N * P
    k1, k2, key = jax.random.split(key, 3)
    x = jax.random.normal(k1, (B, C, L), jnp.float32)
    w, b = make_params(k2, C, P, E)
    out = patch_embedding(x, w, b, P, compute_dtype=jnp.float32)
    jax.block_until_ready(out)
    assert out.shape == (B, N, E)
    assert jnp.allclose(out, reference(x, w, b, P), atol=1e-5, rtol=1e-5)

    # --- Case 3: B=1, ragged N tile (masked tail block) + small unpadded E. -
    B, C, P, E, N = 1, 2, 24, 40, 20
    L = N * P
    k1, k2, key = jax.random.split(key, 3)
    x = jax.random.normal(k1, (B, C, L), jnp.float32)
    w, b = make_params(k2, C, P, E)
    out = patch_embedding(x, w, b, P, compute_dtype=jnp.float32)
    jax.block_until_ready(out)
    assert out.shape == (B, N, E)
    assert jnp.allclose(out, reference(x, w, b, P), atol=1e-5, rtol=1e-5)

    print("KERNEL_OK")
</pallas_src>

<mosaic_0001>
module attributes {stable_mosaic.version = 11 : i64} {
  func.func @_patch_embed_kernel(%arg0: i32, %arg1: i32, %arg2: i32, %arg3: memref<1x1x8x20xbf16, #tpu.memory_space<vmem>>, %arg4: memref<1x20x20xbf16, #tpu.memory_space<vmem>>, %arg5: memref<1x20xf32, #tpu.memory_space<vmem>>, %arg6: memref<1x8x20xf32, #tpu.memory_space<vmem>>, %arg7: memref<8x20xf32, #tpu.memory_space<vmem>>) attributes {dimension_semantics = [#tpu.dimension_semantics<parallel>, #tpu.dimension_semantics<parallel>, #tpu.dimension_semantics<arbitrary>], iteration_bounds = array<i64: 2, 1, 1>, scalar_prefetch = 0 : i64, scratch_operands = 1 : i64, tpu.core_type = #tpu.core_type<tc>, window_params = [{transform_indices = @transform_0, window_bounds = array<i64: 1, 1, 8, 20>}, {transform_indices = @transform_1, window_bounds = array<i64: 1, 20, 20>}, {pipeline_mode = #tpu.pipeline_mode<synchronous>, transform_indices = @transform_2, window_bounds = array<i64: 1, 20>}, {transform_indices = @transform_3, window_bounds = array<i64: 1, 8, 20>}]} {
    %c0_i32 = arith.constant 0 : i32
    %0 = arith.cmpi eq, %arg2, %c0_i32 : i32
    %1 = arith.extui %0 : i1 to i32
    %c0_i32_0 = arith.constant 0 : i32
    %2 = arith.cmpi ne, %1, %c0_i32_0 : i32
    scf.if %2 {
      %cst_13 = arith.constant 0.000000e+00 : f32
      %14 = vector.broadcast %cst_13 : f32 to vector<8x20xf32>
      %c0_14 = arith.constant 0 : index
      %c0_15 = arith.constant 0 : index
      %15 = vector.load %arg7[%c0_14, %c0_15] : memref<8x20xf32, #tpu.memory_space<vmem>>, vector<8x20xf32>
      tpu.vector_store %arg7[%c0_14, %c0_15], %14 {strides = array<i32>} : memref<8x20xf32, #tpu.memory_space<vmem>>, vector<8x20xf32>,
    } else {
    }
    %c0 = arith.constant 0 : index
    %c0_1 = arith.constant 0 : index
    %3 = vector.load %arg7[%c0, %c0_1] : memref<8x20xf32, #tpu.memory_space<vmem>>, vector<8x20xf32>
    %c0_2 = arith.constant 0 : index
    %c0_3 = arith.constant 0 : index
    %c0_4 = arith.constant 0 : index
    %c0_5 = arith.constant 0 : index
    %4 = vector.load %arg3[%c0_2, %c0_3, %c0_4, %c0_5] : memref<1x1x8x20xbf16, #tpu.memory_space<vmem>>, vector<1x1x8x20xbf16>
    %5 = vector.shape_cast %4 : vector<1x1x8x20xbf16> to vector<8x20xbf16>
    %c0_6 = arith.constant 0 : index
    %c0_7 = arith.constant 0 : index
    %c0_8 = arith.constant 0 : index
    %6 = vector.load %arg4[%c0_6, %c0_7, %c0_8] : memref<1x20x20xbf16, #tpu.memory_space<vmem>>, vector<1x20x20xbf16>
    %7 = vector.shape_cast %6 : vector<1x20x20xbf16> to vector<20x20xbf16>
    %cst = arith.constant dense<0.000000e+00> : vector<8x20xf32>
    %8 = tpu.matmul %5, %7, %cst {dimension_numbers = #tpu.dot_dimension_numbers<[1], [0], [0], [1], [0, 0, 1, 1], [], []>} : vector<8x20xbf16>, vector<20x20xbf16>, vector<8x20xf32> -> vector<8x20xf32>
    %9 = arith.addf %3, %8 : vector<8x20xf32>
    %c0_9 = arith.constant 0 : index
    %c0_10 = arith.constant 0 : index
    %10 = vector.load %arg7[%c0_9, %c0_10] : memref<8x20xf32, #tpu.memory_space<vmem>>, vector<8x20xf32>
    tpu.vector_store %arg7[%c0_9, %c0_10], %9 {strides = array<i32>} : memref<8x20xf32, #tpu.memory_space<vmem>>, vector<8x20xf32>,
    %c0_i32_11 = arith.constant 0 : i32
    %11 = arith.cmpi eq, %arg2, %c0_i32_11 : i32
    %12 = arith.extui %11 : i1 to i32
    %c0_i32_12 = arith.constant 0 : i32
    %13 = arith.cmpi ne, %12, %c0_i32_12 : i32
    scf.if %13 {
      %c0_13 = arith.constant 0 : index
      %c0_14 = arith.constant 0 : index
      %14 = vector.load %arg7[%c0_13, %c0_14] : memref<8x20xf32, #tpu.memory_space<vmem>>, vector<8x20xf32>
      %c0_15 = arith.constant 0 : index
      %c0_16 = arith.constant 0 : index
      %15 = vector.load %arg5[%c0_15, %c0_16] : memref<1x20xf32, #tpu.memory_space<vmem>>, vector<1x20xf32>
      %16 = vector.broadcast %15 : vector<1x20xf32> to vector<8x20xf32>
      %17 = arith.addf %14, %16 : vector<8x20xf32>
      %c0_17 = arith.constant 0 : index
      %c0_18 = arith.constant 0 : index
      %c0_19 = arith.constant 0 : index
      %18 = vector.load %arg6[%c0_17, %c0_18, %c0_19] : memref<1x8x20xf32, #tpu.memory_space<vmem>>, vector<1x8x20xf32>
      %19 = vector.shape_cast %18 : vector<1x8x20xf32> to vector<8x20xf32>
      %20 = vector.shape_cast %17 : vector<8x20xf32> to vector<1x8x20xf32>
      tpu.vector_store %arg6[%c0_17, %c0_18, %c0_19], %20 {strides = array<i32>} : memref<1x8x20xf32, #tpu.memory_space<vmem>>, vector<1x8x20xf32>,
    } else {
    }
    return
  }
  func.func @transform_0(%arg0: i32, %arg1: i32, %arg2: i32) -> (i32, i32, i32, i32) {
    %c0_i32 = arith.constant 0 : i32
    %c0_i32_0 = arith.constant 0 : i32
    return %arg0, %arg2, %arg1, %c0_i32 : i32, i32, i32, i32
  }
  func.func @transform_1(%arg0: i32, %arg1: i32, %arg2: i32) -> (i32, i32, i32) {
    %c0_i32 = arith.constant 0 : i32
    %c0_i32_0 = arith.constant 0 : i32
    %c0_i32_1 = arith.constant 0 : i32
    return %arg2, %c0_i32, %c0_i32_0 : i32, i32, i32
  }
  func.func @transform_2(%arg0: i32, %arg1: i32, %arg2: i32) -> (i32, i32) {
    %c0_i32 = arith.constant 0 : i32
    %c0_i32_0 = arith.constant 0 : i32
    %c0_i32_1 = arith.constant 0 : i32
    return %c0_i32, %c0_i32_0 : i32, i32
  }
  func.func @transform_3(%arg0: i32, %arg1: i32, %arg2: i32) -> (i32, i32, i32) {
    %c0_i32 = arith.constant 0 : i32
    %c0_i32_0 = arith.constant 0 : i32
    return %arg0, %arg1, %c0_i32 : i32, i32, i32
  }
}

</mosaic_0001>

<bundles_post_ra>
// kernel: tpu_custom_call.1
= control target key start
LH: loop header
LB: loop body
LE: loop exit
PB: predicated region body
PF: predicated region fallthrough
CT: control target
= control target key end

     0   :  { %8 = vsyncpa [#allocation4], 0  ;;  %s882_s0 = inlined_call_operand.hbm [shape: bf16[2,1,8,20], index: 0, kind: input, shape index: {}]   ;;  %s883_s1 = inlined_call_operand.hbm [shape: bf16[1,20,20], index: 1, kind: input, shape index: {}]   ;;  %s884_s2 = inlined_call_operand.vmem [shape: f32[1,20], index: 2, kind: input, shape index: {}]   ;;  %s885_s3 = inlined_call_operand.hbm [shape: f32[2,8,20], index: 3, kind: output, shape index: {}]  }
   0x1   :  { %10 = vsyncpa [#allocation4 + $0x1], 0 }
   0x2   :  { %11 = vsyncpa [#allocation7], 0 }
   0x3   :  { %12 = vsyncpa [#allocation5], 0 }
   0x4   :  { %14 = vsyncpa [#allocation5 + $0x1], 0  ;;  %s707_s12 = smov 0   ;;  %s709_s13 = smov 0  }
   0x5   :  { %s711_s14 = smov 0   ;;  %s713_s15 = smov 0  }
   0x6   :  { %s715_s16 = smov 0   ;;  %s717_s17 = smov 0  }
   0x7 LB: > { %s431_s18 = sadd.s32 4294967295, %s678_s17   ;;  %s432_s19 = sadd.s32 4294967294, %s678_s17   ;;  %s678_s17 = sphi %s717_s17, %s20_s17   ;;  %s674_s16 = sphi %s715_s16, %s903_s16   ;;  %s670_s15 = sphi %s713_s15, %s902_s15   ;;  %s666_s14 = sphi %s711_s14, %s901_s14   ;;  %s662_s13 = sphi %s709_s13, %s900_s13   ;;  %s658_s12 = sphi %s707_s12, %s899_s12  }
   0x8   : > { %p63_p0 = scmp.ne.s32.totalorder %s662_s13, %s658_s12  ;;  %p741_p1 = scmp.eq.s32.totalorder %s431_s18, 0 }
   0x9   : > { %p745_p2 = scmp.eq.s32.totalorder %s431_s18, 1  ;;  %p142_p3 = scmp.eq.s32.totalorder %s432_s19, 1 }
   0xa   : > { %p751_p4 = por %p741_p1, %p63_p0  ;;  %p433_p5 = scmp.ge.s32.totalorder %s678_s17, 1 }
   0xb   : > { %p756_p6 = por %p142_p3, %p63_p0  ;;  %p149_p7 = scmp.lt.s32.totalorder %s678_s17, 3 }
   0xc   : > { %s889_s22 = scalar_select %p751_p4, 1, 0 }
   0xd   : > { %s890_s23 = scalar_select %p756_p6, 1, 0 }
   0xe   : > { %p761_p8 = pnand %p433_p5, %p149_p7  ;;  %s680_s25 = smov [#allocation6]  }
   0xf   : > { %s164_s26 = sshll.u32 %s680_s25, 4  ;;  %s39_s28 = sadd.s32 1, %s674_s16  ;;  %s165_s26 = int_to_ptr.vmem [resolvable:$true] %s164_s26 }
  0x10   : > { %p469_p9 = pneg %p761_p8  ;;  %s551_s29 = scalar_lea.vmem %s165_s26, 192 }
  0x11   : > { %p552_p13 = scmp.ne.s32.totalorder %s165_s26, %s551_s29  ;;  %p559_p5 = scmp.lt.s32.totalorder %s165_s26, %s165_s26 }
  0x12   : > { %p770_p11 = pnand %p469_p9, %p741_p1  ;;  %p560_p7 = scmp.lt.s32.totalorder %s551_s29, %s551_s29 }
  0x14   : > { %p542_p12 = pneg %p770_p11  ;;  %p561_p6 = por %p560_p7, %p559_p5 }
  0x16   : > { %p554_p0 = pnand %p552_p13, %p542_p12 }
  0x18   : > { %p555_p3 = pneg %p554_p0 }
  0x1a   : > { %p562_p4 = pnand %p561_p6, %p555_p3 }
  0x1c   : > { %565 = shalt.err (!%p562_p4)
}
  0x1d   : > { %s681_s30 = smov 64   ;;  %s682_s4 = smov 4  }
  0x1e   : > { %472 = dma.hbm_to_vmem [thread:$0]  (!%p770_p11), %s883_s1, 192, %s165_s26, [#allocation7], %s681_s30, %s681_s30, %s682_s4  }
  0x1f   : > { %p41_p6 = scmp.ge.s32.totalorder %s39_s28, 2  ;;  %s50_s7 = sadd.s32 1, %s666_s14 }
  0x20   : > { %p57_p4 = scmp.ne.s32.totalorder %s666_s14, %s662_s13  ;;  %p58_p9 = scmp.eq.s32.totalorder %s678_s17, 0 }
  0x21   : > { %s905_s28 = smov (%p41_p6, %s39_s28), 0  ;;  %p482_p0 = scmp.lt.s32.totalorder %s678_s17, 2 }
  0x22   : > { %p788_p12 = por %p58_p9, %p57_p4  ;;  %p794_p13 = por %p745_p2, %p57_p4 }
  0x23   : > { %s43_s10 = ssub.s32 %s674_s16, %s905_s28  ;;  %s181_s11 = sand.u32 1, %s666_s14  }
  0x24   : > { %p48_p11 = scmp.eq.s32.totalorder %s43_s10, 0  ;;  %s436_s18 = sshll.u32 %s181_s11, 2 }
  0x25   : > { %s437_s25 = sshll.u32 %s674_s16, 6  ;;  %s185_s30 = scalar_lea.vmem [#allocation3], %s436_s18 }
  0x26   : > { %s803_s19 = scalar_select %p48_p11, %s666_s14, %s50_s7  }
  0x27   : > { %s192_s29 = scalar_lea.hbm %s882_s0, %s437_s25  ;;  %s194_s4 = sshll.u32 %s185_s30, 4  ;;  %s195_s4 = int_to_ptr.vmem [resolvable:$true] %s194_s4 }
  0x28   : > { %p811_p2 = pnand %p482_p0, %p788_p12  ;;  %s182_s5 = scalar_lea.sflag [#allocation4], %s181_s11 }
  0x29   : > { %s579_s6 = scalar_lea.vmem %s195_s4, 64  ;;  %s683_s7 = smov [#allocation3]  }
  0x2a   : > { %p568_p3 = pneg %p811_p2  ;;  %p580_p5 = scmp.ne.s32.totalorder %s195_s4, %s579_s6 }
  0x2b   : > { %s584_s10 = sshll.u32 %s683_s7, 4  ;;  %s585_s10 = int_to_ptr.vmem [resolvable:$false] %s584_s10 }
  0x2c   : > { %p582_p7 = pnand %p580_p5, %p568_p3  ;;  %s586_s25 = scalar_lea.vmem %s585_s10, 128 }
  0x2d   : > { %p587_p4 = scmp.lt.s32.totalorder %s195_s4, %s585_s10  ;;  %p588_p9 = scmp.lt.s32.totalorder %s586_s25, %s579_s6 }
  0x2e   : > { %p583_p6 = pneg %p582_p7 }
  0x2f   : > { %p589_p11 = por %p588_p9, %p587_p4 }
  0x31   : > { %p590_p10 = pnand %p589_p11, %p583_p6 }
  0x33   : > { %593 = shalt.err (!%p590_p10)
}
  0x34   : > { %476 = dma.hbm_to_vmem [thread:$0]  (!%p811_p2), %s192_s29, 64, %s195_s4, %s182_s5  }
  0x35   : > { %203 = sbr.rel (%p761_p8) target bundleno = 289 (0x121), region = 32  ;;  %s822_s8 = sand.u32 (!%p761_p8), 1, %s662_s13  }
  0x36   : > { %s439_s11 = sshll.u32 (!%p761_p8), %s822_s8, 2  ;;  %s206_s18 = scalar_lea.sflag (!%p761_p8), [#allocation4], %s822_s8 }
  0x37   : > { %s209_s26 = scalar_lea.vmem (!%p761_p8), [#allocation3], %s439_s11  ;;  %p896_p12 = scmp.ne.s32.totalorder (!%p761_p8), %s889_s22, 0 }
  0x3a   : > { %645 = dma.done.wait (%p896_p12), %s206_s18, 64  }
  0x3b   : > { %647 = vsyncadd (%p896_p12), %s206_s18, 4294967232 }
  0x3c   : > { %649 = dma.done.wait (%p741_p1), [#allocation7], 192  }
  0x3d   : > { %651 = vsyncadd (%p741_p1), [#allocation7], 4294967104  ;;  %vm241_vm0 = vcmask 162816   ;;  %v684_v0 = vmov 0.0   ;;  %vm685_vm1 = vmmov 0   ;;  %vm261_vm2 = vcmask 1041408  }
  0x3e   : > { %453 = vmatprep.subr.bf16.mxu0 %v684_v0  ;;  %457 = vmatprep.mubr.msk.bf16.mxu0 %vm685_vm1, %v684_v0  ;;  %242 = vst.msk [vmem:[#allocation2] sm:$0xff] %vm241_vm0, %v684_v0  ;;  %v538_v1 = vld [vmem:[#allocation6 + $0x8] ss:$0 sps:$4 sm:$0x33]   ;;  %v539_v3 = vld [vmem:[#allocation6] sm:$0xff]   ;;  %s441_s20 = sshll.u32 %s822_s8, 3 }
  0x3f   : > { %v263_v2 = vsel %vm261_vm2, %v538_v1, 0  ;;  %v244_v4 = vld [vmem:[%s209_s26] sm:$0xf]  ;;  %v445_v11 = vld [vmem:[%s884_s2] ss:$0 sm:$0xff]  ;;  %s447_s27 = sshll.u32 %s670_s15, 7 }
  0x40   : > { %454 = vmatpush3.bf16.msra.mxu0 %v263_v2  ;;  %s235_s29 = scalar_lea.vmem [#allocation8], %s441_s20  ;;  %s333_s5 = scalar_lea.hbm %s885_s3, %s447_s27 }
  0x41   : > { %455 = vmatprep.subr.bf16.mxu0 %v684_v0  ;;  %s335_s30 = sshll.u32 %s235_s29, 4  ;;  %s321_s6 = scalar_lea.sflag [#allocation5], %s822_s8  ;;  %s336_s30 = int_to_ptr.vmem [resolvable:$true] %s335_s30 }
  0x42   : > { %s594_s7 = scalar_lea.vmem %s336_s30, 128  ;;  %s686_s10 = smov [#allocation8]  }
  0x43   : > { %p595_p1 = scmp.ne.s32.totalorder %s336_s30, %s594_s7  ;;  %s598_s25 = sshll.u32 %s686_s10, 4  ;;  %s599_s25 = int_to_ptr.vmem [resolvable:$false] %s598_s25 }
  0x44   : > { %456 = vmatpush3.bf16.msra.mxu0 %v539_v3  ;;  %s600_s15 = scalar_lea.vmem %s599_s25, 256  ;;  %p601_p0 = scmp.lt.s32.totalorder %s336_s30, %s599_s25 }
  0x45   : > { %v243_v5 = vld [vmem:[#allocation2] sm:$0xff]  ;;  %p596_p8 = pnand %p595_p1, %p794_p13  ;;  %p602_p2 = scmp.lt.s32.totalorder %s600_s15, %s594_s7 }
  0x47   : > { %458 = vmatmul.mubr.msk.bf16.vlgmr.msra.gmra.mxu0 %vm241_vm0, %v244_v4  ;;  %p597_p10 = pneg %p596_p8  ;;  %p603_p3 = por %p602_p2, %p601_p0 }
  0x49   : > { %p604_p5 = pnand %p603_p3, %p597_p10 }
 0x107   : > { %v299_v6 = vpop.f32.mrf.mxu0 }
 0x108   : > { %v305_v7 = vadd.f32 %v299_v6, %v243_v5 }
 0x109   : > { %v459_v8 = vpop.f32.mrf.mxu0 }
 0x10a   : > { %306 = vst.msk [vmem:[#allocation2] sm:$0xff] %vm241_vm0, %v305_v7 }
 0x10b   : > { %v302_v9 = vpop.f32.mrf.mxu0 }
 0x10d   : > { %v460_v10 = vpop.f32.mrf.mxu0 }
 0x111   : > { %v310_v12 = vld [vmem:[#allocation2] sm:$0xff] }
 0x112   : > { %v318_v13 = vadd.f32 %v445_v11, %v310_v12 }
 0x114   : > { %319 = vst.msk [vmem:[%s235_s29] sm:$0xff] %vm241_vm0, %v318_v13 }
 0x115   : > { %607 = shalt.err (!%p604_p5)
}
 0x116   : > { %s608_s11 = scalar_lea.hbm %s333_s5, 128  ;;  %s612_s26 = scalar_lea.hbm %s885_s3, 256 }
 0x117   : > { %p609_p7 = scmp.ne.s32.totalorder %s333_s5, %s608_s11  ;;  %p613_p9 = scmp.lt.s32.totalorder %s333_s5, %s885_s3 }
 0x118   : > { %p614_p11 = scmp.lt.s32.totalorder %s612_s26, %s608_s11 }
 0x119   : > { %p610_p6 = pnand %p609_p7, %p794_p13 }
 0x11a   : > { %p615_p12 = por %p614_p11, %p613_p9 }
 0x11b   : > { %p611_p4 = pneg %p610_p6 }
 0x11d   : > { %p616_p1 = pnand %p615_p12, %p611_p4 }
 0x11f   : > { %619 = shalt.err (!%p616_p1)
}
 0x120   : > { %467 = dma.vmem_to_hbm [thread:$0]  (%p794_p13), %s336_s30, 128, %s333_s5, %s321_s6  }
 0x121 PF: > { %s347_s24 = sand.u32 1, %s658_s12   ;;  %p897_p8 = scmp.ne.s32.totalorder %s890_s23, 0 }
 0x122   : > { %p898_p10 = scmp.ge.s32.totalorder %s678_s17, 2  ;;  %s348_s27 = scalar_lea.sflag [#allocation5], %s347_s24 }
 0x124   : > { %p478_p0 = pnand %p898_p10, %p897_p8 }
 0x126   : > { %p479_p2 = pneg %p478_p0 }
 0x128   : > { %653 = dma.done.wait (%p479_p2), %s348_s27, 128  }
 0x129   : > { %655 = vsyncadd (%p479_p2), %s348_s27, 4294967168  ;;  %s20_s17 = sadd.s32 1, %s678_s17   ;;  %s899_s12 = smov %s662_s13 }
 0x12a   : > { %p17_p3 = scmp.ge.s32.totalorder %s20_s17, 4   ;;  %s900_s13 = smov %s666_s14 }
 0x12b   : > { %s901_s14 = smov %s803_s19  ;;  %s902_s15 = smov %s674_s16 }
 0x12c   : > { %s903_s16 = smov %s905_s28  ;;  %19 = sbr.rel (!%p17_p3) target bundleno = 7 (0x7), region = 90 }
 0x131   :  { %353 = vsyncpa [#allocation4], 1 }
 0x132   :  { %355 = vsyncpa [#allocation4 + $0x1], 1 }
 0x133   :  { %356 = vsyncpa [#allocation7], 1 }
 0x134   :  { %357 = vsyncpa [#allocation5], 1 }
 0x135   :  { %359 = vsyncpa [#allocation5 + $0x1], 1 }

</bundles_post_ra>
